<compile_context>
chip_gen: v7x
topology: tpu7x:2x2x1
jax: 0.10.0
libtpu: 0.0.40
codegen_flags: <defaults>
</compile_context>

<pallas_src>
import functools
import math

import jax
import jax.numpy as jnp
from jax.experimental import pallas as pl
from jax.experimental.pallas import tpu as pltpu


# ----------------------------------------------------------------------------
# Tiling configuration (sized for v7x's 64 MiB VMEM; fine on v5e/v6e too)
# ----------------------------------------------------------------------------
_TM, _TN, _TK = 256, 256, 512          # matmul tiles (~2.6 MiB double-buffered)
_TQ, _TKV = 256, 512                   # attention tiles
_VMEM_LIMIT = 48 * 1024 * 1024         # above 32 MiB scoped default, below v7x's 64 MiB


def _pick_tile(dim, pref, align):
    """Largest tile <= pref that is a multiple of `align` and divides `dim`.
    Falls back to the full dim (always a legal block shape)."""
    if dim <= pref:
        return dim
    t = (pref // align) * align
    while t >= align:
        if dim % t == 0:
            return t
        t -= align
    return dim  # TODO(synk): ragged dims fall back to a single (un-tiled) block.


# ----------------------------------------------------------------------------
# Pallas kernels
# ----------------------------------------------------------------------------
_DN_T = (((1,), (1,)), ((), ()))       # contract x[:, k] with w[:, k]  (== x @ w.T)


def _matmul_kernel(x_ref, w_ref, o_ref, acc_ref):
    # x: (tm, tk), w: (tn, tk)  ->  o: (tm, tn)   (torch.matmul(input, weight.T))
    k = pl.program_id(2)

    @pl.when(k == 0)
    def _():
        acc_ref[...] = jnp.zeros_like(acc_ref)

    acc_ref[...] += jax.lax.dot_general(
        x_ref[...], w_ref[...], _DN_T, preferred_element_type=jnp.float32
    )

    @pl.when(k == pl.num_programs(2) - 1)
    def _():
        o_ref[...] = acc_ref[...].astype(o_ref.dtype)


def _up_gate_kernel(x_ref, wg_ref, wu_ref, o_ref, acc_g_ref, acc_u_ref, *, act_fn):
    # Fused gated MLP: out = act_fn(x @ Wg.T) * (x @ Wu.T), per (tm, tn) tile.
    k = pl.program_id(2)

    @pl.when(k == 0)
    def _():
        acc_g_ref[...] = jnp.zeros_like(acc_g_ref)
        acc_u_ref[...] = jnp.zeros_like(acc_u_ref)

    x = x_ref[...]
    acc_g_ref[...] += jax.lax.dot_general(
        x, wg_ref[...], _DN_T, preferred_element_type=jnp.float32)
    acc_u_ref[...] += jax.lax.dot_general(
        x, wu_ref[...], _DN_T, preferred_element_type=jnp.float32)

    @pl.when(k == pl.num_programs(2) - 1)
    def _():
        o_ref[...] = (act_fn(acc_g_ref[...]) * acc_u_ref[...]).astype(o_ref.dtype)


def _stats_kernel(x_ref, cmx_ref, cmn_ref):
    # Streaming per-channel max/min over the M axis (output-resident accumulator).
    i = pl.program_id(0)
    x = x_ref[...]
    bmx = jnp.max(x, axis=0, keepdims=True)
    bmn = jnp.min(x, axis=0, keepdims=True)

    @pl.when(i == 0)
    def _():
        cmx_ref[...] = bmx
        cmn_ref[...] = bmn

    @pl.when(i > 0)
    def _():
        cmx_ref[...] = jnp.maximum(cmx_ref[...], bmx)
        cmn_ref[...] = jnp.minimum(cmn_ref[...], bmn)


def _rope_rotate_half(x):
    # rotate_half(x) = concat([-x2, x1]); roll by D//2 (XLU slot) + sign select (VPU).
    d = x.shape[-1]
    rolled = pltpu.roll(x, d // 2, x.ndim - 1)
    col = jax.lax.broadcasted_iota(jnp.int32, x.shape, x.ndim - 1)
    return jnp.where(col < d // 2, -rolled, rolled)


def _flash_attn_kernel(*refs, scale, neg_clip, causal, has_mask):
    if has_mask:
        (q_ref, k_ref, v_ref, cq_ref, sq_ref, ck_ref, sk_ref, mask_ref,
         o_ref, m_sc, l_sc, acc_sc) = refs
    else:
        (q_ref, k_ref, v_ref, cq_ref, sq_ref, ck_ref, sk_ref,
         o_ref, m_sc, l_sc, acc_sc) = refs
        mask_ref = None

    qi = pl.program_id(1)
    ki = pl.program_id(2)

    @pl.when(ki == 0)
    def _():
        m_sc[...] = jnp.full_like(m_sc, -jnp.inf)
        l_sc[...] = jnp.zeros_like(l_sc)
        acc_sc[...] = jnp.zeros_like(acc_sc)

    q = q_ref[...].astype(jnp.float32)
    k = k_ref[...].astype(jnp.float32)
    # Fused RoPE on the q/k tiles (applied pre-scale, same as the reference).
    q = q * cq_ref[...].astype(jnp.float32) + _rope_rotate_half(q) * sq_ref[...].astype(jnp.float32)
    k = k * ck_ref[...].astype(jnp.float32) + _rope_rotate_half(k) * sk_ref[...].astype(jnp.float32)

    s = jax.lax.dot_general(q * scale, k, _DN_T,
                            preferred_element_type=jnp.float32)     # (tq, tkv)
    if has_mask:
        s = s + mask_ref[...].astype(jnp.float32)
    if causal:
        tq, tkv = s.shape
        row = qi * tq + jax.lax.broadcasted_iota(jnp.int32, s.shape, 0)
        col = ki * tkv + jax.lax.broadcasted_iota(jnp.int32, s.shape, 1)
        s = jnp.where(row >= col, s, neg_clip)
    s = jnp.maximum(s, neg_clip)            # torch.max(attn, finfo(input.dtype).min)

    # Online softmax (float32, as the reference softmax dtype).
    m_new = jnp.maximum(m_sc[...], jnp.max(s, axis=-1, keepdims=True))
    alpha = jnp.exp(m_sc[...] - m_new)
    p = jnp.exp(s - m_new)
    l_sc[...] = alpha * l_sc[...] + jnp.sum(p, axis=-1, keepdims=True)
    acc_sc[...] = alpha * acc_sc[...] + jnp.dot(
        p, v_ref[...].astype(jnp.float32), preferred_element_type=jnp.float32)
    m_sc[...] = m_new

    @pl.when(ki == pl.num_programs(2) - 1)
    def _():
        o_ref[...] = (acc_sc[...] * pl.reciprocal(l_sc[...], approx=True)).astype(o_ref.dtype)


# ----------------------------------------------------------------------------
# Pallas wrappers
# ----------------------------------------------------------------------------
def matmul_wt(x2d, weight, out_dtype=jnp.float32):
    """x2d: (M, K); weight: (O, K).  Returns x2d @ weight.T : (M, O)."""
    M, K = x2d.shape
    O, K2 = weight.shape
    assert K == K2
    tm = _pick_tile(M, _TM, 8)
    tn = _pick_tile(O, _TN, 128)
    tk = _pick_tile(K, _TK, 128)
    return pl.pallas_call(
        _matmul_kernel,
        out_shape=jax.ShapeDtypeStruct((M, O), out_dtype),
        grid=(pl.cdiv(M, tm), pl.cdiv(O, tn), pl.cdiv(K, tk)),
        in_specs=[
            pl.BlockSpec((tm, tk), lambda i, j, k: (i, k)),
            pl.BlockSpec((tn, tk), lambda i, j, k: (j, k)),   # (O, K) layout, no .T copy
        ],
        out_specs=pl.BlockSpec((tm, tn), lambda i, j, k: (i, j)),
        scratch_shapes=[pltpu.VMEM((tm, tn), jnp.float32)],
        compiler_params=pltpu.CompilerParams(
            dimension_semantics=("parallel", "parallel", "arbitrary"),
            vmem_limit_bytes=_VMEM_LIMIT),
    )(x2d, weight)


def up_gate(x2d, weight, act_fn=jax.nn.silu, out_dtype=jnp.float32):
    """Fused up_and_gate: act_fn(x @ Wg.T) * (x @ Wu.T); weight: (2*H, K) = [gate; up]."""
    M, K = x2d.shape
    O2, K2 = weight.shape
    assert K == K2 and O2 % 2 == 0
    H = O2 // 2
    tm = _pick_tile(M, _TM, 8)
    tn = _pick_tile(H, _TN, 128)
    tk = _pick_tile(K, _TK, 128)
    up_block_off = H // tn     # block-index offset of the "up" half inside weight
    kern = functools.partial(_up_gate_kernel, act_fn=act_fn)
    return pl.pallas_call(
        kern,
        out_shape=jax.ShapeDtypeStruct((M, H), out_dtype),
        grid=(pl.cdiv(M, tm), pl.cdiv(H, tn), pl.cdiv(K, tk)),
        in_specs=[
            pl.BlockSpec((tm, tk), lambda i, j, k: (i, k)),
            pl.BlockSpec((tn, tk), lambda i, j, k: (j, k)),                       # gate half
            pl.BlockSpec((tn, tk), lambda i, j, k, off=up_block_off: (j + off, k)),  # up half
        ],
        out_specs=pl.BlockSpec((tm, tn), lambda i, j, k: (i, j)),
        scratch_shapes=[pltpu.VMEM((tm, tn), jnp.float32),
                        pltpu.VMEM((tm, tn), jnp.float32)],
        compiler_params=pltpu.CompilerParams(
            dimension_semantics=("parallel", "parallel", "arbitrary"),
            vmem_limit_bytes=_VMEM_LIMIT),
    )(x2d, weight, weight)   # same HBM array, two block views — no copies


def channel_stats(x3d):
    """Returns (cmx[C], cmn[C], amx[], amn[]) matching the torch reductions."""
    B, N, C = x3d.shape
    M = B * N
    x2d = x3d.reshape(M, C)
    # Keep each (tm, C) block around 8 MiB so double-buffering fits v7x VMEM.
    row_bytes = C * x2d.dtype.itemsize
    tm_pref = max(8, min(2048, (8 * 1024 * 1024) // max(1, row_bytes)))
    tm_pref = max(8, (tm_pref // 8) * 8)
    tm = _pick_tile(M, tm_pref, 8)
    cmx, cmn = pl.pallas_call(
        _stats_kernel,
        out_shape=(jax.ShapeDtypeStruct((1, C), x3d.dtype),
                   jax.ShapeDtypeStruct((1, C), x3d.dtype)),
        grid=(pl.cdiv(M, tm),),
        in_specs=[pl.BlockSpec((tm, C), lambda i: (i, 0))],
        out_specs=(pl.BlockSpec((1, C), lambda i: (0, 0)),
                   pl.BlockSpec((1, C), lambda i: (0, 0))),
        compiler_params=pltpu.CompilerParams(
            dimension_semantics=("arbitrary",),
            vmem_limit_bytes=_VMEM_LIMIT),
    )(x2d)
    cmx, cmn = cmx[0], cmn[0]
    zero = jnp.zeros((), x3d.dtype)
    amx = jnp.maximum(jnp.max(cmx), zero)    # max(input.max(), 0)
    amn = jnp.minimum(jnp.min(cmn), zero)    # min(input.min(), 0)
    return cmx, cmn, amx, amn


def flash_attention(q, k, v, cos, sin, *, num_heads, num_kv_heads, head_dim,
                    attn_mask=None, causal=False, out_dtype=jnp.float32):
    """q: (B*nh, N, D); k, v: (B*nkv, N, D) (GQA heads are NOT repeated —
    the kv BlockSpec index_map aliases them).  cos/sin: (N, D).
    attn_mask: optional additive (B, 1, N, N) mask (aliased over heads)."""
    BH, N, D = q.shape
    n_rep = num_heads // num_kv_heads
    tq = _pick_tile(N, _TQ, 8)
    tkv = _pick_tile(N, _TKV, 128)
    has_mask = attn_mask is not None

    def q_map(b, qi, ki):
        return (b, qi, 0)

    def kv_map(b, qi, ki):
        batch = b // num_heads
        h = b % num_heads
        return (batch * num_kv_heads + h // n_rep, ki, 0)

    def cosq_map(b, qi, ki):
        return (qi, 0)

    def cosk_map(b, qi, ki):
        return (ki, 0)

    in_specs = [
        pl.BlockSpec((None, tq, D), q_map),
        pl.BlockSpec((None, tkv, D), kv_map),
        pl.BlockSpec((None, tkv, D), kv_map),
        pl.BlockSpec((tq, D), cosq_map),
        pl.BlockSpec((tq, D), cosq_map),
        pl.BlockSpec((tkv, D), cosk_map),
        pl.BlockSpec((tkv, D), cosk_map),
    ]
    args = [q, k, v, cos, sin, cos, sin]
    if has_mask:
        def mask_map(b, qi, ki):
            return (b // num_heads, 0, qi, ki)
        in_specs.append(pl.BlockSpec((None, None, tq, tkv), mask_map))
        args.append(attn_mask)

    kern = functools.partial(
        _flash_attn_kernel,
        scale=1.0 / math.sqrt(head_dim),
        neg_clip=float(jnp.finfo(q.dtype).min),   # finfo(input.dtype).min, as in torch
        causal=causal,
        has_mask=has_mask)

    return pl.pallas_call(
        kern,
        out_shape=jax.ShapeDtypeStruct((BH, N, D), out_dtype),
        grid=(BH, pl.cdiv(N, tq), pl.cdiv(N, tkv)),
        in_specs=in_specs,
        out_specs=pl.BlockSpec((None, tq, D), q_map),
        scratch_shapes=[pltpu.VMEM((tq, 1), jnp.float32),
                        pltpu.VMEM((tq, 1), jnp.float32),
                        pltpu.VMEM((tq, D), jnp.float32)],
        compiler_params=pltpu.CompilerParams(
            dimension_semantics=("parallel", "parallel", "arbitrary"),
            vmem_limit_bytes=_VMEM_LIMIT),
    )(*args)


# ----------------------------------------------------------------------------
# Glue
# ----------------------------------------------------------------------------
def _apply_observation_mask(out3d, obs_mask):
    # torch: output[observation_mask == 1].to(float32)
    # TODO(synk): a general (non-all-ones) observation_mask needs a dynamic-shape
    # gather; this port assumes the calibration-time all-ones mask, so the boolean
    # selection lowers to a plain reshape (no device->host sync).
    del obs_mask
    B, N, C = out3d.shape
    return out3d.reshape(B * N, C).astype(jnp.float32)


# ----------------------------------------------------------------------------
# MigratorBase
# ----------------------------------------------------------------------------
class MigratorBase:
    """JAX/Pallas port of the __init__-time compute of QQQ's MigratorBase."""

    def __init__(self, input, weight, module_type, extra_dict=None):
        self.input = input            # (B, N, C)
        self.weight = weight          # (O, C)
        self.module_type = module_type
        self.extra_dict = extra_dict or {}
        self.dtype = input.dtype

        # per-channel & global activation ranges (tiled streaming Pallas reduction)
        self.cmx, self.cmn, self.amx, self.amn = channel_stats(input)

        # reference fp32 output of the chosen llama path (Pallas matmul/attention kernels)
        self.output = self.get_output(input, weight)
        # TODO(synk): MinMaxObserver / fake-quantize / migration-loss search depend on
        # external qconfig classes and are not reproduced here.

    def get_output(self, x, w):
        if self.module_type == "qkv":
            return self.qkv_function(x, w)
        elif self.module_type == "o_proj":
            return self.out_function(x, w)
        elif self.module_type == "up_and_gate":
            return self.up_function(x, w)
        elif self.module_type == "down_proj":
            return self.down_function(x, w)
        raise NotImplementedError(self.module_type)

    def qkv_function(self, x, w):
        B, N, C = x.shape
        ed = self.extra_dict
        hd, nh, nkv = ed["head_dim"], ed["num_heads"], ed["num_key_value_heads"]
        sz_q, sz_kv = nh * hd, nkv * hd

        qkv = matmul_wt(x.reshape(B * N, C), w, out_dtype=x.dtype).reshape(B, N, -1)
        q = qkv[..., :sz_q].reshape(B, N, nh, hd).transpose(0, 2, 1, 3).reshape(B * nh, N, hd)
        k = qkv[..., sz_q:sz_q + sz_kv].reshape(B, N, nkv, hd).transpose(0, 2, 1, 3).reshape(B * nkv, N, hd)
        v = qkv[..., sz_q + sz_kv:].reshape(B, N, nkv, hd).transpose(0, 2, 1, 3).reshape(B * nkv, N, hd)

        # If the caller declares the attention mask to be the standard causal mask,
        # generate it in-kernel (iota) instead of DMA-ing an additive (B,1,N,N) tensor.
        causal = bool(ed.get("attention_mask_is_causal", False))
        amask = None if causal else ed.get("attention_mask", None)

        out = flash_attention(q, k, v, ed["cos_cached"], ed["sin_cached"],
                              num_heads=nh, num_kv_heads=nkv, head_dim=hd,
                              attn_mask=amask, causal=causal,
                              out_dtype=jnp.float32)       # (B*nh, N, hd)
        out = out.reshape(B, nh, N, hd).transpose(0, 2, 1, 3).reshape(B, N, C)
        return _apply_observation_mask(out, ed["observation_mask"])

    def out_function(self, x, w):
        B, N, C = x.shape
        out = matmul_wt(x.reshape(B * N, C), w, out_dtype=jnp.float32).reshape(B, N, -1)
        return _apply_observation_mask(out, self.extra_dict["observation_mask"])

    def up_function(self, x, w):
        B, N, C = x.shape
        act_fn = self.extra_dict.get("act_fn", jax.nn.silu)
        out = up_gate(x.reshape(B * N, C), w, act_fn=act_fn,
                      out_dtype=jnp.float32).reshape(B, N, -1)
        return _apply_observation_mask(out, self.extra_dict["observation_mask"])

    def down_function(self, x, w):
        B, N, C = x.shape
        out = matmul_wt(x.reshape(B * N, C), w, out_dtype=jnp.float32).reshape(B, N, -1)
        return _apply_observation_mask(out, self.extra_dict["observation_mask"])

    def forward(self):
        pass


# ----------------------------------------------------------------------------
# Demo
# ----------------------------------------------------------------------------
def _rope_cache(N, head_dim, dtype=jnp.float32, base=10000.0):
    inv_freq = 1.0 / (base ** (jnp.arange(0, head_dim, 2, dtype=jnp.float32) / head_dim))
    t = jnp.arange(N, dtype=jnp.float32)
    freqs = jnp.outer(t, inv_freq)
    emb = jnp.concatenate([freqs, freqs], axis=-1)
    return jnp.cos(emb).astype(dtype), jnp.sin(emb).astype(dtype)


if __name__ == "__main__":
    key = jax.random.PRNGKey(0)
    # Small but lane-aligned llama-like shapes.
    B, N = 2, 16
    num_heads, num_kv_heads, head_dim = 4, 2, 128       # C = num_heads * head_dim
    C = num_heads * head_dim
    n_kv_groups = num_heads // num_kv_heads

    kx, k1, k2, k3, k4 = jax.random.split(key, 5)
    x = jax.random.normal(kx, (B, N, C), jnp.float32)
    w_qkv = 0.1 * jax.random.normal(
        k1, ((num_heads + 2 * num_kv_heads) * head_dim, C), jnp.float32)
    w_o = 0.1 * jax.random.normal(k2, (C, C), jnp.float32)
    w_up = 0.1 * jax.random.normal(k3, (2 * C, C), jnp.float32)   # [gate; up]
    w_down = 0.1 * jax.random.normal(k4, (C, C), jnp.float32)

    cos, sin = _rope_cache(N, head_dim)
    neg = jnp.finfo(jnp.float32).min
    causal = jnp.where(jnp.tril(jnp.ones((N, N), dtype=bool)), 0.0, neg)
    attn_mask = jnp.broadcast_to(causal, (B, 1, N, N)).astype(jnp.float32)
    obs_mask = jnp.ones((B, N), dtype=jnp.int32)

    extra = {
        "head_dim": head_dim,
        "num_heads": num_heads,
        "num_key_value_heads": num_kv_heads,
        "num_key_value_groups": n_kv_groups,
        "cos_cached": cos,
        "sin_cached": sin,
        "attention_mask": attn_mask,
        "attention_mask_is_causal": True,   # use the in-kernel iota causal mask
        "observation_mask": obs_mask,
        "act_fn": jax.nn.silu,              # traced into the Pallas up_gate kernel
    }

    results = {}
    for mtype, w in [
        ("qkv", w_qkv),
        ("o_proj", w_o),
        ("up_and_gate", w_up),
        ("down_proj", w_down),
    ]:
        m = MigratorBase(x, w, mtype, extra)
        jax.block_until_ready(m.output)
        jax.block_until_ready((m.cmx, m.cmn, m.amx, m.amn))
        results[mtype] = m.output

    # Cross-check the two attention-mask code paths (in-kernel causal vs. DMA'd
    # additive mask aliased over heads) — they must agree.
    extra_mask = dict(extra)
    extra_mask["attention_mask_is_causal"] = False
    m_mask = MigratorBase(x, w_qkv, "qkv", extra_mask)
    jax.block_until_ready(m_mask.output)
    assert jnp.allclose(results["qkv"], m_mask.output, rtol=1e-5, atol=1e-5)

    print("KERNEL_OK")
</pallas_src>

<mosaic_0001>
module attributes {stable_mosaic.version = 11 : i64} {
  func.func @_stats_kernel(%arg0: i32, %arg1: memref<32x512xf32, #tpu.memory_space<vmem>>, %arg2: memref<1x512xf32, #tpu.memory_space<vmem>>, %arg3: memref<1x512xf32, #tpu.memory_space<vmem>>) attributes {dimension_semantics = [#tpu.dimension_semantics<arbitrary>], iteration_bounds = array<i64: 1>, scalar_prefetch = 0 : i64, scratch_operands = 0 : i64, tpu.core_type = #tpu.core_type<tc>, window_params = [{transform_indices = @transform_0, window_bounds = array<i64: 32, 512>}, {pipeline_mode = #tpu.pipeline_mode<synchronous>, transform_indices = @transform_1, window_bounds = array<i64: 1, 512>}, {pipeline_mode = #tpu.pipeline_mode<synchronous>, transform_indices = @transform_2, window_bounds = array<i64: 1, 512>}]} {
    %c0 = arith.constant 0 : index
    %c0_0 = arith.constant 0 : index
    %0 = vector.load %arg1[%c0, %c0_0] : memref<32x512xf32, #tpu.memory_space<vmem>>, vector<32x512xf32>
    %cst = arith.constant dense<0xFF800000> : vector<512xf32>
    %1 = vector.multi_reduction <maximumf>, %0, %cst [0] : vector<32x512xf32> to vector<512xf32>
    %2 = vector.shape_cast %1 : vector<512xf32> to vector<1x512xf32>
    %cst_1 = arith.constant dense<0x7F800000> : vector<512xf32>
    %3 = vector.multi_reduction <minimumf>, %0, %cst_1 [0] : vector<32x512xf32> to vector<512xf32>
    %4 = vector.shape_cast %3 : vector<512xf32> to vector<1x512xf32>
    %c0_i32 = arith.constant 0 : i32
    %5 = arith.cmpi eq, %arg0, %c0_i32 : i32
    %6 = arith.extui %5 : i1 to i32
    %c0_i32_2 = arith.constant 0 : i32
    %7 = arith.cmpi ne, %6, %c0_i32_2 : i32
    scf.if %7 {
      %c0_5 = arith.constant 0 : index
      %c0_6 = arith.constant 0 : index
      %11 = vector.load %arg2[%c0_5, %c0_6] : memref<1x512xf32, #tpu.memory_space<vmem>>, vector<1x512xf32>
      tpu.vector_store %arg2[%c0_5, %c0_6], %2 {strides = array<i32>} : memref<1x512xf32, #tpu.memory_space<vmem>>, vector<1x512xf32>,
      %c0_7 = arith.constant 0 : index
      %c0_8 = arith.constant 0 : index
      %12 = vector.load %arg3[%c0_7, %c0_8] : memref<1x512xf32, #tpu.memory_space<vmem>>, vector<1x512xf32>
      tpu.vector_store %arg3[%c0_7, %c0_8], %4 {strides = array<i32>} : memref<1x512xf32, #tpu.memory_space<vmem>>, vector<1x512xf32>,
    } else {
    }
    %c0_i32_3 = arith.constant 0 : i32
    %8 = arith.cmpi sgt, %arg0, %c0_i32_3 : i32
    %9 = arith.extui %8 : i1 to i32
    %c0_i32_4 = arith.constant 0 : i32
    %10 = arith.cmpi ne, %9, %c0_i32_4 : i32
    scf.if %10 {
      %c0_5 = arith.constant 0 : index
      %c0_6 = arith.constant 0 : index
      %11 = vector.load %arg2[%c0_5, %c0_6] : memref<1x512xf32, #tpu.memory_space<vmem>>, vector<1x512xf32>
      %12 = arith.maximumf %11, %2 : vector<1x512xf32>
      %c0_7 = arith.constant 0 : index
      %c0_8 = arith.constant 0 : index
      %13 = vector.load %arg2[%c0_7, %c0_8] : memref<1x512xf32, #tpu.memory_space<vmem>>, vector<1x512xf32>
      tpu.vector_store %arg2[%c0_7, %c0_8], %12 {strides = array<i32>} : memref<1x512xf32, #tpu.memory_space<vmem>>, vector<1x512xf32>,
      %c0_9 = arith.constant 0 : index
      %c0_10 = arith.constant 0 : index
      %14 = vector.load %arg3[%c0_9, %c0_10] : memref<1x512xf32, #tpu.memory_space<vmem>>, vector<1x512xf32>
      %15 = arith.minimumf %14, %4 : vector<1x512xf32>
      %c0_11 = arith.constant 0 : index
      %c0_12 = arith.constant 0 : index
      %16 = vector.load %arg3[%c0_11, %c0_12] : memref<1x512xf32, #tpu.memory_space<vmem>>, vector<1x512xf32>
      tpu.vector_store %arg3[%c0_11, %c0_12], %15 {strides = array<i32>} : memref<1x512xf32, #tpu.memory_space<vmem>>, vector<1x512xf32>,
    } else {
    }
    return
  }
  func.func @transform_0(%arg0: i32) -> (i32, i32) {
    %c0_i32 = arith.constant 0 : i32
    %c0_i32_0 = arith.constant 0 : i32
    return %arg0, %c0_i32 : i32, i32
  }
  func.func @transform_1(%arg0: i32) -> (i32, i32) {
    %c0_i32 = arith.constant 0 : i32
    %c0_i32_0 = arith.constant 0 : i32
    %c0_i32_1 = arith.constant 0 : i32
    return %c0_i32, %c0_i32_0 : i32, i32
  }
  func.func @transform_2(%arg0: i32) -> (i32, i32) {
    %c0_i32 = arith.constant 0 : i32
    %c0_i32_0 = arith.constant 0 : i32
    %c0_i32_1 = arith.constant 0 : i32
    return %c0_i32, %c0_i32_0 : i32, i32
  }
}

</mosaic_0001>

<bundles_post_ra>
// kernel: tpu_custom_call.1
= control target key start
LH: loop header
LB: loop body
LE: loop exit
PB: predicated region body
PF: predicated region fallthrough
CT: control target
= control target key end

     0   :  { %8 = vsyncpa [#allocation3], 0  ;;  %s428_s0 = inlined_call_operand.hbm [shape: f32[32,512], index: 0, kind: input, shape index: {}]   ;;  %s429_s1 = inlined_call_operand.hbm [shape: f32[1,512], index: 1, kind: output, shape index: {0}]   ;;  %s430_s2 = inlined_call_operand.hbm [shape: f32[1,512], index: 2, kind: output, shape index: {1}]  }
   0x1   :  { %9 = vsyncpa [#allocation4], 0 }
   0x2   :  { %10 = vsyncpa [#allocation7], 0  ;;  %s361_s9 = smov [#allocation2]   ;;  %s289_s13 = scalar_lea.hbm %s428_s0, 2048 }
   0x3   :  { %s16_s10 = sshll.u32 %s361_s9, 4  ;;  %p290_p0 = scmp.ne.s32.totalorder %s428_s0, %s289_s13  ;;  %s17_s10 = int_to_ptr.vmem [resolvable:$true] %s16_s10 }
   0x4   :  { %p293_p1 = scmp.lt.u32.totalorder %s289_s13, %s428_s0 }
   0x6   :  { %p295_p2 = pnand %p293_p1, %p290_p0 }
   0x8   :  { %298 = shalt.err (!%p295_p2)
}
   0x9   :  { %s299_s18 = scalar_lea.vmem %s17_s10, 2048  ;;  %p304_p4 = scmp.lt.s32.totalorder %s17_s10, %s17_s10 }
   0xa   :  { %p300_p3 = scmp.ne.s32.totalorder %s17_s10, %s299_s18  ;;  %p305_p5 = scmp.lt.s32.totalorder %s299_s18, %s299_s18 }
   0xc   :  { %p306_p6 = por %p305_p5, %p304_p4 }
   0xe   :  { %p307_p7 = pnand %p306_p6, %p300_p3 }
  0x10   :  { %310 = shalt.err (!%p307_p7)
}
  0x11   :  { %s362_s19 = smov 512   ;;  %s363_s20 = smov 32  }
  0x12   :  { %22 = dma.hbm_to_vmem [thread:$0]  %s428_s0, 2048, %s17_s10, [#allocation3], %s362_s19, %s362_s19, %s363_s20  }
  0x13   :  { %355 = dma.done.wait [#allocation3], 2048  }
  0x14   :  { %356 = vsyncadd [#allocation3], 4294965248  ;;  %v127_v0 = vlaneseq  ;;  %v364_v1 = vmov 1966171168   ;;  %v26_v5 = vld [vmem:[#allocation2] sm:$0xff]  ;;  %v27_v6 = vld [vmem:[#allocation2 + $0x8] sm:$0xff] }
  0x15   :  { %v125_v2 = vunpack.c.l.s4 %v364_v1  ;;  %v28_v7 = vld [vmem:[#allocation2 + $0x10] sm:$0xff]  ;;  %v29_v8 = vld [vmem:[#allocation2 + $0x18] sm:$0xff]  ;;  %v30_v9 = vld [vmem:[#allocation2 + $0x20] sm:$0xff]  ;;  %s365_s0 = smov [#allocation5]   ;;  %s366_s24 = smov [#allocation6]  }
  0x16   :  { %v128_v4 = vshrl.u32 %v127_v0, 7  ;;  %v31_v10 = vld [vmem:[#allocation2 + $0x28] sm:$0xff]  ;;  %v32_v12 = vld [vmem:[#allocation2 + $0x30] sm:$0xff]  ;;  %v33_v13 = vld [vmem:[#allocation2 + $0x38] sm:$0xff]  ;;  %v42_v15 = vmax.f32 %v26_v5, %v30_v9  ;;  %v78_v17 = vmin.f32 %v26_v5, %v30_v9  ;;  %s260_s23 = sshll.u32 %s365_s0, 4  ;;  %s270_s25 = sshll.u32 %s366_s24, 4  ;;  %s261_s23 = int_to_ptr.vmem [resolvable:$true] %s260_s23  ;;  %s271_s25 = int_to_ptr.vmem [resolvable:$true] %s270_s25 }
  0x17   :  { %v126_v3 = vunpack.c.0.s8 %v125_v2  ;;  %v34_v14 = vld [vmem:[#allocation2 + $0x40] sm:$0xff]  ;;  %v51_v16 = vmax.f32 %v27_v6, %v31_v10  ;;  %v87_v18 = vmin.f32 %v27_v6, %v31_v10  ;;  %v35_v19 = vld [vmem:[#allocation2 + $0x48] sm:$0xff]  ;;  %v36_v20 = vld [vmem:[#allocation2 + $0x50] sm:$0xff]  ;;  %v60_v22 = vmax.f32 %v28_v7, %v32_v12  ;;  %s311_s26 = scalar_lea.vmem %s261_s23, 64  ;;  %p316_p9 = scmp.lt.s32.totalorder %s261_s23, %s261_s23 }
  0x18   :  { %v37_v21 = vld [vmem:[#allocation2 + $0x58] sm:$0xff]  ;;  %v69_v23 = vmax.f32 %v29_v8, %v33_v13  ;;  %v96_v24 = vmin.f32 %v28_v7, %v32_v12  ;;  %v105_v25 = vmin.f32 %v29_v8, %v33_v13  ;;  %v38_v26 = vld [vmem:[#allocation2 + $0x60] sm:$0xff]  ;;  %v39_v27 = vld [vmem:[#allocation2 + $0x68] sm:$0xff]  ;;  %v43_v29 = vmax.f32 %v42_v15, %v34_v14  ;;  %p312_p8 = scmp.ne.s32.totalorder %s261_s23, %s311_s26  ;;  %p317_p10 = scmp.lt.s32.totalorder %s311_s26, %s311_s26 }
  0x19   :  { %v395_v11 = vsub.s32 %v126_v3, %v128_v4  ;;  %v40_v28 = vld [vmem:[#allocation2 + $0x70] sm:$0xff]  ;;  %v52_v30 = vmax.f32 %v51_v16, %v35_v19  ;;  %v79_v31 = vmin.f32 %v78_v17, %v34_v14  ;;  %v88_v32 = vmin.f32 %v87_v18, %v35_v19  ;;  %v41_v33 = vld [vmem:[#allocation2 + $0x78] sm:$0xff] }
  0x1a   :  { %v61_v34 = vmax.f32 %v60_v22, %v36_v20  ;;  %v70_v35 = vmax.f32 %v69_v23, %v37_v21  ;;  %v97_v36 = vmin.f32 %v96_v24, %v36_v20  ;;  %v106_v37 = vmin.f32 %v105_v25, %v37_v21  ;;  %p318_p11 = por %p317_p10, %p316_p9 }
  0x1b   :  { %v44_v38 = vmax.f32 %v43_v29, %v38_v26  ;;  %v53_v39 = vmax.f32 %v52_v30, %v39_v27  ;;  %v80_v40 = vmin.f32 %v79_v31, %v38_v26  ;;  %v89_v41 = vmin.f32 %v88_v32, %v39_v27 }
  0x1c   :  { %v62_v42 = vmax.f32 %v61_v34, %v40_v28  ;;  %v71_v43 = vmax.f32 %v70_v35, %v41_v33  ;;  %v98_v44 = vmin.f32 %v97_v36, %v40_v28  ;;  %v107_v45 = vmin.f32 %v106_v37, %v41_v33  ;;  %p319_p12 = pnand %p318_p11, %p312_p8 }
  0x1d   :  { %v45_v46 = vrot.slane %v44_v38, 4  ;;  %v54_v47 = vrot.slane %v53_v39, 4  ;;  %v81_v48 = vrot.slane %v80_v40, 4  ;;  %v90_v49 = vrot.slane %v89_v41, 4 }
  0x1e   :  { %v63_v50 = vrot.slane %v62_v42, 4  ;;  %v72_v51 = vrot.slane %v71_v43, 4  ;;  %v99_v52 = vrot.slane %v98_v44, 4  ;;  %v108_v53 = vrot.slane %v107_v45, 4 }
  0x1f   :  { %v46_v54 = vmax.f32 %v44_v38, %v45_v46  ;;  %v55_v55 = vmax.f32 %v53_v39, %v54_v47  ;;  %v82_v56 = vmin.f32 %v80_v40, %v81_v48  ;;  %v91_v57 = vmin.f32 %v89_v41, %v90_v49 }
  0x20   :  { %v64_v58 = vmax.f32 %v62_v42, %v63_v50  ;;  %v73_v59 = vmax.f32 %v71_v43, %v72_v51  ;;  %v100_v60 = vmin.f32 %v98_v44, %v99_v52  ;;  %v109_v61 = vmin.f32 %v107_v45, %v108_v53 }
  0x21   :  { %v47_v62 = vrot.slane %v46_v54, 2  ;;  %v56_v63 = vrot.slane %v55_v55, 2  ;;  %v83_v1 = vrot.slane %v82_v56, 2  ;;  %v92_v2 = vrot.slane %v91_v57, 2 }
  0x22   :  { %v65_v3 = vrot.slane %v64_v58, 2  ;;  %v74_v4 = vrot.slane %v73_v59, 2  ;;  %v101_v5 = vrot.slane %v100_v60, 2  ;;  %v110_v6 = vrot.slane %v109_v61, 2 }
  0x23   :  { %v48_v7 = vmax.f32 %v46_v54, %v47_v62  ;;  %v57_v8 = vmax.f32 %v55_v55, %v56_v63  ;;  %v84_v9 = vmin.f32 %v82_v56, %v83_v1  ;;  %v93_v10 = vmin.f32 %v91_v57, %v92_v2 }
  0x24   :  { %v66_v12 = vmax.f32 %v64_v58, %v65_v3  ;;  %v75_v13 = vmax.f32 %v73_v59, %v74_v4  ;;  %v102_v14 = vmin.f32 %v100_v60, %v101_v5  ;;  %v111_v15 = vmin.f32 %v109_v61, %v110_v6 }
  0x25   :  { %v49_v16 = vrot.slane %v48_v7, 1  ;;  %v58_v17 = vrot.slane %v57_v8, 1  ;;  %v85_v18 = vrot.slane %v84_v9, 1  ;;  %v94_v19 = vrot.slane %v93_v10, 1 }
  0x26   :  { %v67_v20 = vrot.slane %v66_v12, 1  ;;  %v76_v21 = vrot.slane %v75_v13, 1  ;;  %v103_v22 = vrot.slane %v102_v14, 1  ;;  %v112_v23 = vrot.slane %v111_v15, 1 }
  0x27   :  { %v50_v24 = vmax.f32 %v48_v7, %v49_v16  ;;  %v59_v25 = vmax.f32 %v57_v8, %v58_v17  ;;  %v86_v26 = vmin.f32 %v84_v9, %v85_v18  ;;  %v95_v27 = vmin.f32 %v93_v10, %v94_v19 }
  0x28   :  { %v68_v28 = vmax.f32 %v66_v12, %v67_v20  ;;  %v77_v29 = vmax.f32 %v75_v13, %v76_v21  ;;  %v104_v30 = vmin.f32 %v102_v14, %v103_v22  ;;  %v113_v31 = vmin.f32 %v111_v15, %v112_v23 }
  0x29   :  { %v122_v32 = vcombine.low %v50_v24, %v59_v25  ;;  %v156_v33 = vcombine.low %v86_v26, %v95_v27  ;;  %vm149_vm0 = vcmp.lt.s32.totalorder %v127_v0, 512 }
  0x2a   :  { %v123_v34 = vcombine.low %v68_v28, %v77_v29  ;;  %v157_v35 = vcombine.low %v104_v30, %v113_v31 }
  0x2b   :  { %v130_v36 = vrot.slane %v122_v32, %v395_v11  ;;  %v164_v37 = vrot.slane %v156_v33, %v395_v11 }
  0x2c   :  { %v137_v38 = vrot.slane %v123_v34, %v395_v11  ;;  %v171_v39 = vrot.slane %v157_v35, %v395_v11 }
  0x2e   :  { %v138_v40 = vcombine.low %v130_v36, %v137_v38  ;;  %v172_v41 = vcombine.low %v164_v37, %v171_v39 }
  0x30   :  { %v145_v42 = vrot.slane %v138_v40, %v395_v11  ;;  %v179_v43 = vrot.slane %v172_v41, %v395_v11 }
  0x32   :  { %151 = vst.msk [vmem:[#allocation5] sm:$0xf] %vm149_vm0, %v145_v42  ;;  %181 = vst.msk [vmem:[#allocation6] sm:$0xf] %vm149_vm0, %v179_v43 }
  0x33   :  { %322 = shalt.err (!%p319_p12)
}
  0x34   :  { %s323_s29 = scalar_lea.hbm %s429_s1, 64 }
  0x35   :  { %p324_p13 = scmp.ne.s32.totalorder %s429_s1, %s323_s29  ;;  %p327_p0 = scmp.lt.u32.totalorder %s323_s29, %s429_s1 }
  0x37   :  { %p329_p1 = pnand %p327_p0, %p324_p13 }
  0x39   :  { %332 = shalt.err (!%p329_p1)
}
  0x3a   :  { %263 = dma.vmem_to_hbm [thread:$0]  %s261_s23, 64, %s429_s1, [#allocation4]  }
  0x3b   :  { %s333_s8 = scalar_lea.vmem %s271_s25, 64  ;;  %p338_p3 = scmp.lt.s32.totalorder %s271_s25, %s271_s25 }
  0x3c   :  { %p334_p2 = scmp.ne.s32.totalorder %s271_s25, %s333_s8  ;;  %p339_p4 = scmp.lt.s32.totalorder %s333_s8, %s333_s8 }
  0x3e   :  { %p340_p5 = por %p339_p4, %p338_p3 }
  0x40   :  { %p341_p6 = pnand %p340_p5, %p334_p2 }
  0x42   :  { %344 = shalt.err (!%p341_p6)
}
  0x43   :  { %s345_s11 = scalar_lea.hbm %s430_s2, 64 }
  0x44   :  { %p346_p7 = scmp.ne.s32.totalorder %s430_s2, %s345_s11  ;;  %p349_p8 = scmp.lt.u32.totalorder %s345_s11, %s430_s2 }
  0x46   :  { %p351_p9 = pnand %p349_p8, %p346_p7 }
  0x48   :  { %354 = shalt.err (!%p351_p9)
}
  0x49   :  { %273 = dma.vmem_to_hbm [thread:$0]  %s271_s25, 64, %s430_s2, [#allocation7]  }
  0x4a   :  { %357 = dma.done.wait [#allocation4], 64  }
  0x4b   :  { %358 = vsyncadd [#allocation4], 4294967232 }
  0x4c   :  { %359 = dma.done.wait [#allocation7], 64  }
  0x4d   :  { %360 = vsyncadd [#allocation7], 4294967232 }
  0x4e   :  { %280 = vsyncpa [#allocation3], 1 }
  0x4f   :  { %281 = vsyncpa [#allocation4], 1 }
  0x50   :  { %282 = vsyncpa [#allocation7], 1 }

</bundles_post_ra>
